<compile_context>
chip_gen: v7x
topology: tpu7x:2x2x1
jax: 0.10.0
libtpu: 0.0.40
codegen_flags: <defaults>
</compile_context>

<pallas_src>
import jax
import jax.numpy as jnp
from jax.experimental import pallas as pl
from jax.experimental.pallas import tpu as pltpu


def _dynamic_linear_kernel(x_ref, w_ref, b_ref, o_ref):
    # x_ref : (1, s_tile, in_dim)    one sequence tile of this batch's input
    # w_ref : (1, in_dim, out_p)     this batch's generated weight (bf16, lane-padded)
    # b_ref : (1, 1, out_p)          this batch's generated bias   (f32,  lane-padded)
    # o_ref : (1, s_tile, out_p)
    x = x_ref[0].astype(jnp.bfloat16)                               # (s_tile, in_dim)
    y = jnp.dot(x, w_ref[0], preferred_element_type=jnp.float32)    # MXU, f32 acc
    o_ref[0] = (y + b_ref[0]).astype(o_ref.dtype)                   # f32 epilogue


def _round_up(v, m):
    return (v + m - 1) // m * m


def _padded_vmem_bytes(shape, itemsize):
    """Rough (8,128)-tile-padded VMEM footprint of one buffer of `shape`."""
    if len(shape) == 1:
        return _round_up(shape[0], 128) * 8 * itemsize
    lead = 1
    for d in shape[:-2]:
        lead *= d
    return lead * _round_up(shape[-2], 8) * _round_up(shape[-1], 128) * itemsize


def _pick_s_tile(S, in_dim, out_p, x_itemsize, out_itemsize):
    """Largest sublane-aligned tile fitting a ~24 MiB tile budget (double-buffered)."""
    budget = 24 * 1024 * 1024
    per_row = 2 * (_round_up(in_dim, 128) * x_itemsize + out_p * out_itemsize)
    max_rows = max(8, (budget // per_row) // 8 * 8)
    s8 = _round_up(S, 8)
    return int(min(s8, max_rows, 8192))


def dynamic_linear(x, mu, wd, bd, V, *, in_dim, out_dim, k):
    """x: (B, S, in_dim), mu: (B, mu_dim), wd: ((in_dim+1)*k, mu_dim),
    bd: ((in_dim+1)*k,), V: (k, out_dim)  ->  (B, S, out_dim)"""
    B, S, _ = x.shape
    rows = in_dim + 1

    # ---- glue: generate per-batch weight/bias in XLA (exact, tiny contraction) ----
    U = (mu @ wd.T + bd).reshape(B, rows, k)                 # (B, rows, k)
    param = jnp.einsum('brk,ko->bro', U, V)                  # (B, rows, out_dim)
    weight = param[:, :in_dim, :]                            # (B, in_dim, out_dim)
    bias = param[:, in_dim, :]                               # (B, out_dim)

    # ---- lane-dense output: pad out_dim to a multiple of 128, slice afterwards ----
    out_p = max(128, _round_up(out_dim, 128))
    pad_o = out_p - out_dim
    weight_p = jnp.pad(weight, ((0, 0), (0, 0), (0, pad_o))).astype(jnp.bfloat16)
    bias_p = jnp.pad(bias, ((0, 0), (0, pad_o))).astype(jnp.float32)
    bias_p = bias_p.reshape(B, 1, out_p)

    # ---- sequence tiling: VMEM-budget-derived tile, pad S to a tile multiple ----
    x_itemsize = jnp.dtype(x.dtype).itemsize
    s_tile = _pick_s_tile(S, in_dim, out_p, x_itemsize, x_itemsize)
    S_pad = pl.cdiv(S, s_tile) * s_tile
    x_p = jnp.pad(x, ((0, 0), (0, S_pad - S), (0, 0))) if S_pad != S else x
    grid = (B, S_pad // s_tile)

    # ---- explicit VMEM budget from the chosen block sizes ----
    vmem_est = (
        2 * _padded_vmem_bytes((1, s_tile, in_dim), x_itemsize)     # x   (double buf)
        + 2 * _padded_vmem_bytes((1, s_tile, out_p), x_itemsize)    # out (double buf)
        + 2 * _padded_vmem_bytes((1, in_dim, out_p), 2)             # weight (bf16)
        + 2 * _padded_vmem_bytes((1, 1, out_p), 4)                  # bias
    )
    try:
        vmem_cap = int(pltpu.get_tpu_info().vmem_capacity_bytes)
    except Exception:
        vmem_cap = 64 * 1024 * 1024
    ceiling = int(vmem_cap * 0.75)                                   # headroom (v7x!)
    vmem_limit = int(min(ceiling, max(2 * vmem_est, 32 * 1024 * 1024)))

    out = pl.pallas_call(
        _dynamic_linear_kernel,
        out_shape=jax.ShapeDtypeStruct((B, S_pad, out_p), x.dtype),
        grid=grid,
        in_specs=[
            pl.BlockSpec((1, s_tile, in_dim), lambda b, s: (b, s, 0)),
            pl.BlockSpec((1, in_dim, out_p), lambda b, s: (b, 0, 0)),
            pl.BlockSpec((1, 1, out_p), lambda b, s: (b, 0, 0)),
        ],
        out_specs=pl.BlockSpec((1, s_tile, out_p), lambda b, s: (b, s, 0)),
        compiler_params=pltpu.CompilerParams(
            dimension_semantics=("parallel", "parallel"),
            vmem_limit_bytes=vmem_limit,
        ),
    )(x_p, weight_p, bias_p)

    return out[:, :S, :out_dim]


def reference(x, mu, wd, bd, V, *, in_dim, out_dim, k):
    """Pure-JAX (f32) reference mirroring the PyTorch forward."""
    B = mu.shape[0]
    U = (mu @ wd.T + bd).reshape(B, in_dim + 1, k)
    param = jnp.einsum('bik,kj->bij', U, V)
    weight = param[:, :-1, :]
    bias = param[:, -1, :]
    y = jnp.einsum('bsd,bde->bse', x, weight)
    return y + bias[:, None, :]


if __name__ == "__main__":
    B, S = 2, 8
    in_dim, out_dim, mu_dim, k = 32, 32, 16, 30

    key = jax.random.PRNGKey(0)
    kx, kmu, kwd, kbd, kv = jax.random.split(key, 5)

    x = jax.random.normal(kx, (B, S, in_dim), dtype=jnp.float32)
    mu = jax.random.normal(kmu, (B, mu_dim), dtype=jnp.float32)

    # ParamDecoder parameters (deterministic synthetic init).
    # nn.Linear(mu_dim, (in_dim+1)*k): weight ((in_dim+1)*k, mu_dim), bias ((in_dim+1)*k,)
    wd = 0.1 * jax.random.normal(kwd, ((in_dim + 1) * k, mu_dim), dtype=jnp.float32)
    bd = 0.1 * jax.random.normal(kbd, ((in_dim + 1) * k,), dtype=jnp.float32)
    # V is torch.zeros((k, out_dim)) in the PyTorch __init__; random values make the
    # output non-trivial for testing.
    V = 0.1 * jax.random.normal(kv, (k, out_dim), dtype=jnp.float32)

    out = dynamic_linear(x, mu, wd, bd, V, in_dim=in_dim, out_dim=out_dim, k=k)
    out = jax.block_until_ready(out)

    ref = jax.block_until_ready(
        reference(x, mu, wd, bd, V, in_dim=in_dim, out_dim=out_dim, k=k))

    assert out.shape == (B, S, out_dim), out.shape
    # bf16 operands in the main GEMM (f32 accumulation) -> slightly looser tolerance.
    err = float(jnp.max(jnp.abs(out - ref)))
    assert err < 5e-2, f"max abs error too large: {err}"

    print("KERNEL_OK")
</pallas_src>

<mosaic_0001>
module attributes {stable_mosaic.version = 11 : i64} {
  func.func @_dynamic_linear_kernel(%arg0: i32, %arg1: i32, %arg2: memref<1x8x32xf32, #tpu.memory_space<vmem>>, %arg3: memref<1x32x128xbf16, #tpu.memory_space<vmem>>, %arg4: memref<1x1x128xf32, #tpu.memory_space<vmem>>, %arg5: memref<1x8x128xf32, #tpu.memory_space<vmem>>) attributes {dimension_semantics = [#tpu.dimension_semantics<parallel>, #tpu.dimension_semantics<parallel>], iteration_bounds = array<i64: 2, 1>, scalar_prefetch = 0 : i64, scratch_operands = 0 : i64, tpu.core_type = #tpu.core_type<tc>, window_params = [{transform_indices = @transform_0, window_bounds = array<i64: 1, 8, 32>}, {transform_indices = @transform_1, window_bounds = array<i64: 1, 32, 128>}, {transform_indices = @transform_2, window_bounds = array<i64: 1, 1, 128>}, {transform_indices = @transform_3, window_bounds = array<i64: 1, 8, 128>}]} {
    %c0 = arith.constant 0 : index
    %c0_0 = arith.constant 0 : index
    %c0_1 = arith.constant 0 : index
    %0 = vector.load %arg2[%c0, %c0_0, %c0_1] : memref<1x8x32xf32, #tpu.memory_space<vmem>>, vector<1x8x32xf32>
    %1 = vector.shape_cast %0 : vector<1x8x32xf32> to vector<8x32xf32>
    %2 = arith.truncf %1 : vector<8x32xf32> to vector<8x32xbf16>
    %c0_2 = arith.constant 0 : index
    %c0_3 = arith.constant 0 : index
    %c0_4 = arith.constant 0 : index
    %3 = vector.load %arg3[%c0_2, %c0_3, %c0_4] : memref<1x32x128xbf16, #tpu.memory_space<vmem>>, vector<1x32x128xbf16>
    %4 = vector.shape_cast %3 : vector<1x32x128xbf16> to vector<32x128xbf16>
    %cst = arith.constant dense<0.000000e+00> : vector<8x128xf32>
    %5 = tpu.matmul %2, %4, %cst {dimension_numbers = #tpu.dot_dimension_numbers<[1], [0], [0], [1], [0, 0, 1, 1], [], []>} : vector<8x32xbf16>, vector<32x128xbf16>, vector<8x128xf32> -> vector<8x128xf32>
    %c0_5 = arith.constant 0 : index
    %c0_6 = arith.constant 0 : index
    %c0_7 = arith.constant 0 : index
    %6 = vector.load %arg4[%c0_5, %c0_6, %c0_7] : memref<1x1x128xf32, #tpu.memory_space<vmem>>, vector<1x1x128xf32>
    %7 = vector.shape_cast %6 : vector<1x1x128xf32> to vector<1x128xf32>
    %8 = vector.broadcast %7 : vector<1x128xf32> to vector<8x128xf32>
    %9 = arith.addf %5, %8 : vector<8x128xf32>
    %c0_8 = arith.constant 0 : index
    %c0_9 = arith.constant 0 : index
    %c0_10 = arith.constant 0 : index
    %10 = vector.load %arg5[%c0_8, %c0_9, %c0_10] : memref<1x8x128xf32, #tpu.memory_space<vmem>>, vector<1x8x128xf32>
    %11 = vector.shape_cast %10 : vector<1x8x128xf32> to vector<8x128xf32>
    %12 = vector.shape_cast %9 : vector<8x128xf32> to vector<1x8x128xf32>
    tpu.vector_store %arg5[%c0_8, %c0_9, %c0_10], %12 {strides = array<i32>} : memref<1x8x128xf32, #tpu.memory_space<vmem>>, vector<1x8x128xf32>,
    return
  }
  func.func @transform_0(%arg0: i32, %arg1: i32) -> (i32, i32, i32) {
    %c0_i32 = arith.constant 0 : i32
    %c0_i32_0 = arith.constant 0 : i32
    return %arg0, %arg1, %c0_i32 : i32, i32, i32
  }
  func.func @transform_1(%arg0: i32, %arg1: i32) -> (i32, i32, i32) {
    %c0_i32 = arith.constant 0 : i32
    %c0_i32_0 = arith.constant 0 : i32
    %c0_i32_1 = arith.constant 0 : i32
    return %arg0, %c0_i32, %c0_i32_0 : i32, i32, i32
  }
  func.func @transform_2(%arg0: i32, %arg1: i32) -> (i32, i32, i32) {
    %c0_i32 = arith.constant 0 : i32
    %c0_i32_0 = arith.constant 0 : i32
    %c0_i32_1 = arith.constant 0 : i32
    return %arg0, %c0_i32, %c0_i32_0 : i32, i32, i32
  }
  func.func @transform_3(%arg0: i32, %arg1: i32) -> (i32, i32, i32) {
    %c0_i32 = arith.constant 0 : i32
    %c0_i32_0 = arith.constant 0 : i32
    return %arg0, %arg1, %c0_i32 : i32, i32, i32
  }
}

</mosaic_0001>

<bundles_post_ra>
// kernel: tpu_custom_call.1
= control target key start
LH: loop header
LB: loop body
LE: loop exit
PB: predicated region body
PF: predicated region fallthrough
CT: control target
= control target key end

     0   :  { %8 = vsyncpa [#allocation3], 0  ;;  %s964_s0 = inlined_call_operand.hbm [shape: f32[2,8,32], index: 0, kind: input, shape index: {}]   ;;  %s965_s1 = inlined_call_operand.hbm [shape: bf16[2,32,128], index: 1, kind: input, shape index: {}]   ;;  %s966_s2 = inlined_call_operand.vmem [shape: f32[2,1,128], index: 2, kind: input, shape index: {}]   ;;  %s967_s3 = inlined_call_operand.hbm [shape: f32[2,8,128], index: 3, kind: output, shape index: {}]  }
   0x1   :  { %10 = vsyncpa [#allocation3 + $0x1], 0 }
   0x2   :  { %11 = vsyncpa [#allocation6], 0 }
   0x3   :  { %13 = vsyncpa [#allocation6 + $0x1], 0 }
   0x4   :  { %14 = vsyncpa [#allocation4], 0 }
   0x5   :  { %16 = vsyncpa [#allocation4 + $0x1], 0  ;;  %s736_s12 = smov 0   ;;  %s738_s13 = smov 0  }
   0x6   :  { %s740_s14 = smov 0   ;;  %s742_s15 = smov 0  }
   0x7   :  { %s744_s16 = smov 0   ;;  %s746_s17 = smov 0  }
   0x8 LB: > { %s455_s18 = sadd.s32 4294967295, %s707_s17   ;;  %s456_s19 = sadd.s32 4294967294, %s707_s17   ;;  %s707_s17 = sphi %s746_s17, %s22_s17   ;;  %s703_s16 = sphi %s744_s16, %s986_s16   ;;  %s699_s15 = sphi %s742_s15, %s985_s15   ;;  %s695_s14 = sphi %s740_s14, %s984_s14   ;;  %s691_s13 = sphi %s738_s13, %s983_s13   ;;  %s687_s12 = sphi %s736_s12, %s982_s12  }
   0x9   : > { %s34_s20 = sadd.s32 1, %s703_s16  ;;  %s43_s21 = sadd.s32 1, %s695_s14 }
   0xa   : > { %p36_p0 = scmp.ge.s32.totalorder %s34_s20, 2  ;;  %p50_p1 = scmp.ne.s32.totalorder %s695_s14, %s691_s13 }
   0xb   : > { %p51_p2 = scmp.eq.s32.totalorder %s707_s17, 0  ;;  %p56_p3 = scmp.ne.s32.totalorder %s691_s13, %s687_s12 }
   0xc   : > { %s988_s20 = smov (%p36_p0, %s34_s20), 0  ;;  %p57_p5 = scmp.eq.s32.totalorder %s455_s18, 0 }
   0xd   : > { %p777_p4 = por %p51_p2, %p50_p1  ;;  %s38_s23 = ssub.s32 %s703_s16, %s988_s20 }
   0xe   : > { %p134_p6 = scmp.eq.s32.totalorder %s455_s18, 1  ;;  %p41_p7 = scmp.eq.s32.totalorder %s38_s23, 0 }
   0xf   : > { %p783_p8 = por %p57_p5, %p56_p3  ;;  %p140_p10 = scmp.eq.s32.totalorder %s456_s19, 1 }
  0x10   : > { %p787_p9 = por %p134_p6, %p50_p1  ;;  %p505_p13 = scmp.lt.s32.totalorder %s707_s17, 2 }
  0x11   : > { %s971_s24 = scalar_select %p783_p8, 1, 0 }
  0x12   : > { %s972_s25 = scalar_select %p787_p9, 1, 0 }
  0x13   : > { %s792_s26 = scalar_select %p41_p7, %s695_s14, %s43_s21  }
  0x14   : > { %p794_p11 = por %p140_p10, %p56_p3  ;;  %s801_s28 = sand.u32 1, %s695_s14  }
  0x15   : > { %s459_s29 = sshll.u32 %s801_s28, 3  ;;  %s460_s30 = sshll.u32 %s703_s16, 7 }
  0x16   : > { %s973_s27 = scalar_select %p794_p11, 1, 0 }
  0x17   : > { %s808_s6 = scalar_lea.hbm %s964_s0, %s460_s30  ;;  %s164_s7 = scalar_lea.vmem [#allocation2], %s459_s29 }
  0x18   : > { %s172_s8 = sshll.u32 %s164_s7, 4  ;;  %p814_p0 = pnand %p505_p13, %p777_p4  ;;  %s810_s8 = int_to_ptr.vmem [resolvable:$true] %s172_s8 }
  0x19   : > { %s161_s10 = scalar_lea.sflag [#allocation3], %s801_s28  ;;  %s561_s11 = scalar_lea.hbm %s808_s6, 128 }
  0x1a   : > { %p562_p3 = scmp.ne.s32.totalorder %s808_s6, %s561_s11  ;;  %p563_p5 = pneg %p814_p0 }
  0x1b   : > { %s566_s21 = scalar_lea.hbm %s964_s0, 256  ;;  %p567_p4 = scmp.lt.u32.totalorder %s808_s6, %s964_s0 }
  0x1c   : > { %p564_p6 = pnand %p563_p5, %p562_p3  ;;  %p568_p10 = scmp.lt.u32.totalorder %s566_s21, %s561_s11 }
  0x1d   : > { %p570_p12 = scmp.lt.u32.totalorder %s561_s11, %s808_s6 }
  0x1e   : > { %p565_p7 = pneg %p564_p6  ;;  %p569_p13 = por %p568_p10, %p567_p4 }
  0x20   : > { %p571_p1 = por %p570_p12, %p569_p13 }
  0x22   : > { %p572_p2 = pnand %p571_p1, %p565_p7 }
  0x24   : > { %575 = shalt.err (!%p572_p2)
}
  0x25   : > { %s576_s29 = scalar_lea.vmem %s810_s8, 128  ;;  %s709_s30 = smov [#allocation2]  }
  0x26   : > { %p577_p3 = scmp.ne.s32.totalorder %s810_s8, %s576_s29  ;;  %s581_s4 = sshll.u32 %s709_s30, 4  ;;  %s582_s4 = int_to_ptr.vmem [resolvable:$false] %s581_s4 }
  0x27   : > { %s583_s5 = scalar_lea.vmem %s582_s4, 256  ;;  %p584_p9 = scmp.lt.s32.totalorder %s810_s8, %s582_s4 }
  0x28   : > { %p579_p6 = pnand %p577_p3, %p563_p5  ;;  %p585_p4 = scmp.lt.s32.totalorder %s583_s5, %s576_s29 }
  0x2a   : > { %p580_p11 = pneg %p579_p6  ;;  %p586_p10 = por %p585_p4, %p584_p9 }
  0x2c   : > { %p587_p12 = pnand %p586_p10, %p580_p11 }
  0x2e   : > { %590 = shalt.err (!%p587_p12)
}
  0x2f   : > { %497 = dma.hbm_to_vmem [thread:$0]  (!%p814_p0), %s808_s6, 128, %s810_s8, %s161_s10  }
  0x30   : > { %p975_p1 = scmp.lt.s32.totalorder %s707_s17, 3  ;;  %p976_p2 = scmp.ge.s32.totalorder %s707_s17, 1 }
  0x31   : > { %s461_s11 = sshll.u32 %s801_s28, 4  ;;  %s476_s18 = sshll.u32 %s703_s16, 8 }
  0x32   : > { %p850_p7 = pnand %p976_p2, %p975_p1  ;;  %s859_s22 = scalar_lea.hbm %s965_s1, %s476_s18 }
  0x33   : > { %s183_s23 = scalar_lea.vmem [#allocation5], %s461_s11  ;;  %s180_s6 = scalar_lea.sflag [#allocation6], %s801_s28 }
  0x34   : > { %s190_s29 = sshll.u32 %s183_s23, 4  ;;  %s591_s8 = scalar_lea.hbm %s859_s22, 256  ;;  %s861_s29 = int_to_ptr.vmem [resolvable:$true] %s190_s29 }
  0x35   : > { %p592_p9 = scmp.ne.s32.totalorder %s859_s22, %s591_s8  ;;  %s596_s4 = scalar_lea.hbm %s965_s1, 512 }
  0x36   : > { %p597_p3 = scmp.lt.u32.totalorder %s859_s22, %s965_s1  ;;  %p598_p6 = scmp.lt.u32.totalorder %s596_s4, %s591_s8 }
  0x37   : > { %p594_p11 = pnand %p592_p9, %p563_p5  ;;  %p600_p10 = scmp.lt.u32.totalorder %s591_s8, %s859_s22 }
  0x38   : > { %p599_p4 = por %p598_p6, %p597_p3 }
  0x39   : > { %p595_p13 = pneg %p594_p11 }
  0x3a   : > { %p601_p12 = por %p600_p10, %p599_p4 }
  0x3c   : > { %p602_p1 = pnand %p601_p12, %p595_p13 }
  0x3e   : > { %605 = shalt.err (!%p602_p1)
}
  0x3f   : > { %s606_s11 = scalar_lea.vmem %s861_s29, 256  ;;  %s710_s19 = smov [#allocation5]  }
  0x40   : > { %p607_p2 = scmp.ne.s32.totalorder %s861_s29, %s606_s11  ;;  %s611_s21 = sshll.u32 %s710_s19, 4  ;;  %s612_s21 = int_to_ptr.vmem [resolvable:$false] %s611_s21 }
  0x41   : > { %s613_s23 = scalar_lea.vmem %s612_s21, 512  ;;  %p614_p8 = scmp.lt.s32.totalorder %s861_s29, %s612_s21 }
  0x42   : > { %p609_p9 = pnand %p607_p2, %p563_p5  ;;  %p615_p3 = scmp.lt.s32.totalorder %s613_s23, %s606_s11 }
  0x44   : > { %p610_p11 = pneg %p609_p9  ;;  %p616_p6 = por %p615_p3, %p614_p8 }
  0x46   : > { %p617_p4 = pnand %p616_p6, %p610_p11 }
  0x48   : > { %620 = shalt.err (!%p617_p4)
}
  0x49   : > { %s711_s8 = smov 64   ;;  %s712_s10 = smov 4  }
  0x4a   : > { %500 = dma.hbm_to_vmem [thread:$0]  (!%p814_p0), %s859_s22, 256, %s861_s29, %s180_s6, %s711_s8, %s711_s8, %s712_s10  }
  0x4b   : > { %208 = sbr.rel (%p850_p7) target bundleno = 323 (0x143), region = 32  ;;  %s892_s30 = sand.u32 (!%p850_p7), 1, %s691_s13  }
  0x4c   : > { %s465_s4 = sshll.u32 (!%p850_p7), %s892_s30, 3  ;;  %s211_s5 = scalar_lea.sflag (!%p850_p7), [#allocation3], %s892_s30 }
  0x4d   : > { %s214_s18 = scalar_lea.vmem (!%p850_p7), [#allocation2], %s465_s4  ;;  %p978_p8 = scmp.ne.s32.totalorder (!%p850_p7), %s971_s24, 0 }
  0x52   : > { %674 = dma.done.wait (%p978_p8), %s211_s5, 128  }
  0x53   : > { %676 = vsyncadd (%p978_p8), %s211_s5, 4294967168  ;;  %s466_s28 = sshll.u32 %s892_s30, 4  ;;  %s220_s9 = scalar_lea.sflag [#allocation6], %s892_s30 }
  0x54   : > { %s223_s7 = scalar_lea.vmem [#allocation5], %s466_s28 }
  0x55   : > { %678 = dma.done.wait (%p978_p8), %s220_s9, 256  }
  0x56   : > { %680 = vsyncadd (%p978_p8), %s220_s9, 4294967040  ;;  %v713_v0 = vmov 0.0   ;;  %vm714_vm0 = vmmov 0   ;;  %v559_v1 = vld [vmem:[%s223_s7] sm:$0xff]   ;;  %v560_v2 = vld [vmem:[%s223_s7 + $0x8] sm:$0xff]   ;;  %vm283_vm1 = vcmask 261120  }
  0x57   : > { %480 = vmatprep.subr.bf16.mxu0 %v713_v0  ;;  %484 = vmatprep.mubr.msk.bf16.mxu0 %vm714_vm0, %v713_v0  ;;  %v258_v3 = vld [vmem:[%s214_s18] sm:$0xff]  ;;  %p254_p0 = scmp.lt.s32.totalorder %s699_s15, 1  ;;  %s473_s11 = sshll.u32 %s699_s15, 7 }
  0x58   : > { %481 = vmatpush3.bf16.msra.mxu0 %v559_v1  ;;  %v259_v4 = vpack.c.bf16 %v258_v3, %v258_v3  ;;  %s253_s19 = scalar_lea.vmem [#allocation7], %s465_s4  ;;  %s915_s10 = scalar_lea.hbm %s967_s3, %s473_s11 }
  0x59   : > { %482 = vmatprep.subr.bf16.mxu0 %v713_v0  ;;  %s255_s24 = scalar_select %p254_p0, %s699_s15, 1 }
  0x5a   : > { %s343_s21 = sshll.u32 %s253_s19, 4  ;;  %s329_s5 = scalar_lea.sflag [#allocation4], %s892_s30  ;;  %s917_s21 = int_to_ptr.vmem [resolvable:$true] %s343_s21 }
  0x5b   : > { %s256_s6 = scalar_lea.vmem %s966_s2, %s255_s24  ;;  %s621_s15 = scalar_lea.vmem %s917_s21, 128 }
  0x5c   : > { %483 = vmatpush3.bf16.msra.mxu0 %v560_v2  ;;  %v468_v5 = vld [vmem:[%s256_s6] ss:$0 sm:$0xff]  ;;  %p622_p5 = scmp.ne.s32.totalorder %s917_s21, %s621_s15  ;;  %p979_p7 = scmp.ne.s32.totalorder %s972_s25, 0 }
  0x5d   : > { %s715_s4 = smov [#allocation7]  }
  0x5e   : > { %p623_p13 = pnand %p622_p5, %p979_p7  ;;  %s625_s18 = sshll.u32 %s715_s4, 4  ;;  %s626_s18 = int_to_ptr.vmem [resolvable:$false] %s625_s18 }
  0x5f   : > { %485 = vmatmul.mubr.msk.bf16.vlgmr.msra.gmra.mrb[0].mxu0 %vm283_vm1, %v259_v4  ;;  %s627_s28 = scalar_lea.vmem %s626_s18, 256  ;;  %p628_p12 = scmp.lt.s32.totalorder %s917_s21, %s626_s18 }
  0x60   : > { %p624_p10 = pneg %p623_p13  ;;  %p629_p1 = scmp.lt.s32.totalorder %s627_s28, %s621_s15 }
  0x62   : > { %p630_p2 = por %p629_p1, %p628_p12 }
  0x64   : > { %p631_p9 = pnand %p630_p2, %p624_p10 }
 0x132   : > { %v321_v6 = vpop.f32.mrb[0].mxu0 }
 0x133   : > { %v322_v7 = vadd.f32 %v468_v5, %v321_v6  ;;  %v486_v8 = vpop.f32.mrb[1].mxu0 }
 0x134   : > { %v324_v9 = vpop.f32.mrb[2].mxu0 }
 0x135   : > { %327 = vst [vmem:[%s253_s19] sm:$0xff] %v322_v7  ;;  %v487_v10 = vpop.f32.mrb[3].mxu0 }
 0x136   : > { %634 = shalt.err (!%p631_p9)
}
 0x137   : > { %s635_s30 = scalar_lea.hbm %s915_s10, 128  ;;  %s639_s24 = scalar_lea.hbm %s967_s3, 256 }
 0x138   : > { %p636_p11 = scmp.ne.s32.totalorder %s915_s10, %s635_s30  ;;  %p640_p4 = scmp.lt.u32.totalorder %s915_s10, %s967_s3 }
 0x139   : > { %p641_p8 = scmp.lt.u32.totalorder %s639_s24, %s635_s30  ;;  %p643_p5 = scmp.lt.u32.totalorder %s635_s30, %s915_s10 }
 0x13a   : > { %p637_p3 = pnand %p636_p11, %p979_p7 }
 0x13b   : > { %p642_p0 = por %p641_p8, %p640_p4 }
 0x13c   : > { %p638_p6 = pneg %p637_p3 }
 0x13d   : > { %p644_p13 = por %p643_p5, %p642_p0 }
 0x13f   : > { %p645_p10 = pnand %p644_p13, %p638_p6 }
 0x141   : > { %648 = shalt.err (!%p645_p10)
}
 0x142   : > { %492 = dma.vmem_to_hbm [thread:$0]  (%p979_p7), %s917_s21, 128, %s915_s10, %s329_s5  }
 0x143 PF: > { %s355_s6 = sand.u32 1, %s687_s12   ;;  %p980_p12 = scmp.ne.s32.totalorder %s973_s27, 0 }
 0x144   : > { %p981_p1 = scmp.ge.s32.totalorder %s707_s17, 2  ;;  %s356_s11 = scalar_lea.sflag [#allocation4], %s355_s6 }
 0x146   : > { %p502_p2 = pnand %p981_p1, %p980_p12 }
 0x148   : > { %682 = dma.done.wait (!%p502_p2), %s356_s11, 128  }
 0x149   : > { %684 = vsyncadd (!%p502_p2), %s356_s11, 4294967168  ;;  %s22_s17 = sadd.s32 1, %s707_s17   ;;  %s982_s12 = smov %s691_s13 }
 0x14a   : > { %p19_p9 = scmp.ge.s32.totalorder %s22_s17, 4   ;;  %s983_s13 = smov %s695_s14 }
 0x14b   : > { %s984_s14 = smov %s792_s26  ;;  %s985_s15 = smov %s703_s16 }
 0x14c   : > { %s986_s16 = smov %s988_s20  ;;  %21 = sbr.rel (!%p19_p9) target bundleno = 8 (0x8), region = 93 }
 0x153   :  { %361 = vsyncpa [#allocation3], 1 }
 0x154   :  { %363 = vsyncpa [#allocation3 + $0x1], 1 }
 0x155   :  { %364 = vsyncpa [#allocation6], 1 }
 0x156   :  { %366 = vsyncpa [#allocation6 + $0x1], 1 }
 0x157   :  { %367 = vsyncpa [#allocation4], 1 }
 0x158   :  { %369 = vsyncpa [#allocation4 + $0x1], 1 }

</bundles_post_ra>
